<compile_context>
chip_gen: v7x
topology: tpu7x:2x2x1
jax: 0.10.0
libtpu: 0.0.40
codegen_flags: <defaults>
</compile_context>

<pallas_src>
import functools

import jax
import jax.numpy as jnp
from jax import lax
from jax.experimental import pallas as pl
from jax.experimental.pallas import tpu as pltpu


def _round_up(x: int, m: int) -> int:
    return ((x + m - 1) // m) * m


def _vmem_budget_bytes() -> int:
    """Conservative per-core VMEM budget for the current TPU generation."""
    kind = ""
    try:
        kind = jax.devices()[0].device_kind.lower()
    except Exception:  # pragma: no cover - defensive
        pass
    if "v7" in kind or "7x" in kind:
        return 48 * 1024 * 1024            # 64 MiB/TC physical, keep headroom
    if "v5" in kind or "v6" in kind:
        return 100 * 1024 * 1024           # 128 MiB physical
    return 48 * 1024 * 1024                # unknown: stay conservative


def _head_transform_kernel(x_ref, w_ref, b_ref, gamma_ref, beta_ref, o_ref,
                           *, eps: float, approximate_gelu: bool):
    # Dense: x @ W + b.  Operands stay in their storage dtype (bf16 fast path);
    # the MXU accumulates in f32 via preferred_element_type.
    h = jnp.dot(x_ref[...], w_ref[...], preferred_element_type=jnp.float32)
    h = h + b_ref[...]                      # bias already f32, shape (1, H)

    # Activation.
    if approximate_gelu:
        # tanh variant: transcendental goes to the (otherwise idle) EUP slot
        # and roughly halves the VALU op count of the epilogue.
        h = jax.nn.gelu(h, approximate=True)
    else:
        # Exact erf GELU: strict torch.nn.functional.gelu / ACT2FN["gelu"] parity.
        h = 0.5 * h * (1.0 + lax.erf(h * jnp.float32(0.7071067811865476)))

    # LayerNorm over the hidden (last) axis -- two-pass statistics in f32.
    inv_h = jnp.float32(1.0 / h.shape[-1])
    mu = jnp.sum(h, axis=-1, keepdims=True) * inv_h
    centered = h - mu
    var = jnp.sum(centered * centered, axis=-1, keepdims=True) * inv_h
    y = centered * lax.rsqrt(var + jnp.float32(eps))
    y = y * gamma_ref[...] + beta_ref[...]

    o_ref[...] = y.astype(o_ref.dtype)


def bert_prediction_head_transform(x, w, b, gamma, beta, *,
                                   eps: float = 1e-12,
                                   block_m: int | None = None,
                                   approximate_gelu: bool = True,
                                   out_dtype=None):
    """Fused y = LayerNorm(act(x @ w + b)) * gamma + beta.

    x:     [..., H] activations (any float dtype; normalized to w.dtype).
    w:     [H_in, H_out] dense weight, i.e. torch Linear.weight TRANSPOSED
           (ideally already cast to bf16 at the call site).
    b, gamma, beta: [H].
    """
    orig_shape = x.shape
    H = orig_shape[-1]
    assert w.shape == (H, H), "dense weight must be [H_in, H_out]"

    # Normalize the MXU operand dtypes once, in the wrapper: a mixed
    # f32 x bf16 dot would silently fall off the bf16 MXU fast path.
    if x.dtype != w.dtype:
        x = x.astype(w.dtype)

    x2 = x.reshape(-1, H)
    M = x2.shape[0]
    if out_dtype is None:
        out_dtype = x2.dtype              # keep output in storage dtype (bf16)

    # Small params in f32 so the epilogue math is f32 regardless of x dtype.
    b2 = b.astype(jnp.float32).reshape(1, H)
    g2 = gamma.astype(jnp.float32).reshape(1, H)
    be2 = beta.astype(jnp.float32).reshape(1, H)

    x_item = jnp.dtype(x2.dtype).itemsize
    o_item = jnp.dtype(out_dtype).itemsize
    w_bytes = H * H * jnp.dtype(w.dtype).itemsize
    param_bytes = 3 * H * 4

    budget = _vmem_budget_bytes()
    if block_m is None:
        block_m = 1024 if budget >= 96 * 1024 * 1024 else 512

    def footprint(tm_):
        # Conservative: resident operands double-buffered, streamed x/out
        # double-buffered, plus ~3 f32 (tm, H) intermediates (h / centered /
        # temp) materialized by the epilogue in compiler-managed VMEM.
        resident = 2 * (w_bytes + param_bytes)
        stream = 2 * tm_ * H * (x_item + o_item)
        interm = 3 * tm_ * H * 4
        return resident + stream + interm

    # Token tile: target >=2 grid steps (so v7x's two TCs both get work) but
    # never exceed block_m, then shrink until the footprint fits VMEM.
    tm = min(block_m, max(16, _round_up(pl.cdiv(M, 2), 16)))
    tm = _round_up(tm, 16)
    while footprint(tm) > budget and tm > 16:
        tm = max(16, _round_up(tm // 2, 16))
    if tm >= M:
        tm = M                              # single full tile, no masking
    grid = (pl.cdiv(M, tm),)

    vmem_limit = int(min(budget,
                         max(int(footprint(tm) * 1.25) + (1 << 20),
                             16 * 1024 * 1024)))

    cost = pl.CostEstimate(
        flops=2 * M * H * H,
        transcendentals=M * H,
        bytes_accessed=(M * H * x_item            # x streamed in
                        + w_bytes + param_bytes   # resident weight + params
                        + M * H * o_item))        # output streamed out

    kernel = functools.partial(_head_transform_kernel, eps=eps,
                               approximate_gelu=approximate_gelu)

    def _run(single_buffer_resident: bool):
        resident_kwargs = (
            {"pipeline_mode": pl.Buffered(1)} if single_buffer_resident else {})
        in_specs = [
            pl.BlockSpec((tm, H), lambda i: (i, 0)),                     # x tile
            pl.BlockSpec((H, H), lambda i: (0, 0), **resident_kwargs),   # weight
            pl.BlockSpec((1, H), lambda i: (0, 0), **resident_kwargs),   # bias
            pl.BlockSpec((1, H), lambda i: (0, 0), **resident_kwargs),   # gamma
            pl.BlockSpec((1, H), lambda i: (0, 0), **resident_kwargs),   # beta
        ]
        return pl.pallas_call(
            kernel,
            out_shape=jax.ShapeDtypeStruct((M, H), out_dtype),
            grid_spec=pltpu.PrefetchScalarGridSpec(
                num_scalar_prefetch=0,
                grid=grid,
                in_specs=in_specs,
                out_specs=pl.BlockSpec((tm, H), lambda i: (i, 0)),
            ),
            compiler_params=pltpu.CompilerParams(
                dimension_semantics=("parallel",),
                vmem_limit_bytes=vmem_limit),
            cost_estimate=cost,
        )(x2, w, b2, g2, be2)

    try:
        # Single-buffer the resident weight/params (constant index_map).
        out = _run(True)
    except Exception:
        # Fallback if this jax version rejects Buffered(1) on a BlockSpec.
        out = _run(False)

    return out.reshape(orig_shape[:-1] + (H,))


def _reference(x, w, b, gamma, beta, eps, approximate_gelu=True):
    # Same math path as the kernel: storage-dtype matmul with f32 accumulation,
    # f32 activation, two-pass LayerNorm in f32.
    h = jnp.dot(x.astype(w.dtype), w, preferred_element_type=jnp.float32)
    h = h + b.astype(jnp.float32)
    if approximate_gelu:
        h = jax.nn.gelu(h, approximate=True)
    else:
        h = 0.5 * h * (1.0 + lax.erf(h * jnp.float32(0.7071067811865476)))
    mu = jnp.mean(h, axis=-1, keepdims=True)
    var = jnp.mean(jnp.square(h - mu), axis=-1, keepdims=True)
    return ((h - mu) * lax.rsqrt(var + jnp.float32(eps))
            * gamma.astype(jnp.float32) + beta.astype(jnp.float32))


if __name__ == "__main__":
    # Small BERT-ish config: batch=2, seq=8, hidden=128, gelu(tanh), eps=1e-12.
    # (For real tuning run with M >= 4096 tokens and H = 768/1024.)
    B, S, H = 2, 8, 128
    eps = 1e-12

    key = jax.random.PRNGKey(0)
    kx, kw, kb, kg, kbe = jax.random.split(key, 5)

    x = jax.random.normal(kx, (B, S, H), dtype=jnp.float32)
    # torch Linear.weight is [H_out, H_in]; synthesize then transpose for x @ W.
    w_torch = jax.random.normal(kw, (H, H), dtype=jnp.float32) * (1.0 / jnp.sqrt(H))
    b = jax.random.normal(kb, (H,), dtype=jnp.float32) * 0.02
    gamma = 1.0 + 0.1 * jax.random.normal(kg, (H,), dtype=jnp.float32)
    beta = 0.1 * jax.random.normal(kbe, (H,), dtype=jnp.float32)

    # Cast the weight to bf16 ONCE outside the kernel; the wrapper normalizes
    # x to the same dtype (bf16 MXU fast path).
    w = jnp.transpose(w_torch).astype(jnp.bfloat16)     # [H_in, H_out]

    # TODO(synk): default activation is tanh-GELU (EUP fast path); pass
    # approximate_gelu=False for bit-faithful HF ACT2FN["gelu"] (erf) parity.
    out = bert_prediction_head_transform(x, w, b, gamma, beta, eps=eps)
    out = jax.block_until_ready(out)

    ref = _reference(x.reshape(B * S, H), w, b, gamma, beta, eps).reshape(B, S, H)
    assert out.shape == (B, S, H)
    assert out.dtype == jnp.bfloat16
    assert jnp.allclose(out.astype(jnp.float32), ref, atol=5e-2, rtol=5e-2), \
        "mismatch vs reference"

    # Ragged token count exercises the masked-last-tile path (no pad/slice):
    # M=20 with block_m=16 -> grid of 2 steps, second tile partially masked.
    M2 = 20
    x_ragged = jax.random.normal(jax.random.PRNGKey(1), (M2, H), dtype=jnp.float32)
    out2 = jax.block_until_ready(
        bert_prediction_head_transform(x_ragged, w, b, gamma, beta,
                                       eps=eps, block_m=16))
    ref2 = _reference(x_ragged, w, b, gamma, beta, eps)
    assert out2.shape == (M2, H)
    assert jnp.allclose(out2.astype(jnp.float32), ref2, atol=5e-2, rtol=5e-2), \
        "mismatch vs reference (masked ragged-tile path)"

    # f32-output path (for consumers that require it) still works.
    out3 = jax.block_until_ready(
        bert_prediction_head_transform(x, w, b, gamma, beta, eps=eps,
                                       out_dtype=jnp.float32))
    assert out3.dtype == jnp.float32
    assert jnp.allclose(out3, ref, atol=5e-2, rtol=5e-2)

    print("KERNEL_OK")
</pallas_src>

<mosaic_0001>
module attributes {stable_mosaic.version = 11 : i64} {
  func.func @_head_transform_kernel(%arg0: i32, %arg1: memref<16x128xbf16, #tpu.memory_space<vmem>>, %arg2: memref<128x128xbf16, #tpu.memory_space<vmem>>, %arg3: memref<1x128xf32, #tpu.memory_space<vmem>>, %arg4: memref<1x128xf32, #tpu.memory_space<vmem>>, %arg5: memref<1x128xf32, #tpu.memory_space<vmem>>, %arg6: memref<16x128xbf16, #tpu.memory_space<vmem>>) attributes {dimension_semantics = [#tpu.dimension_semantics<parallel>], iteration_bounds = array<i64: 1>, scalar_prefetch = 0 : i64, scratch_operands = 0 : i64, tpu.core_type = #tpu.core_type<tc>, window_params = [{transform_indices = @transform_0, window_bounds = array<i64: 16, 128>}, {pipeline_mode = #tpu.pipeline_mode<synchronous>, transform_indices = @transform_1, window_bounds = array<i64: 128, 128>}, {pipeline_mode = #tpu.pipeline_mode<synchronous>, transform_indices = @transform_2, window_bounds = array<i64: 1, 128>}, {pipeline_mode = #tpu.pipeline_mode<synchronous>, transform_indices = @transform_3, window_bounds = array<i64: 1, 128>}, {pipeline_mode = #tpu.pipeline_mode<synchronous>, transform_indices = @transform_4, window_bounds = array<i64: 1, 128>}, {transform_indices = @transform_5, window_bounds = array<i64: 16, 128>}]} {
    %c0 = arith.constant 0 : index
    %c0_0 = arith.constant 0 : index
    %0 = vector.load %arg1[%c0, %c0_0] : memref<16x128xbf16, #tpu.memory_space<vmem>>, vector<16x128xbf16>
    %c0_1 = arith.constant 0 : index
    %c0_2 = arith.constant 0 : index
    %1 = vector.load %arg2[%c0_1, %c0_2] : memref<128x128xbf16, #tpu.memory_space<vmem>>, vector<128x128xbf16>
    %cst = arith.constant dense<0.000000e+00> : vector<16x128xf32>
    %2 = tpu.matmul %0, %1, %cst {dimension_numbers = #tpu.dot_dimension_numbers<[1], [0], [0], [1], [0, 0, 1, 1], [], []>} : vector<16x128xbf16>, vector<128x128xbf16>, vector<16x128xf32> -> vector<16x128xf32>
    %c0_3 = arith.constant 0 : index
    %c0_4 = arith.constant 0 : index
    %3 = vector.load %arg3[%c0_3, %c0_4] : memref<1x128xf32, #tpu.memory_space<vmem>>, vector<1x128xf32>
    %4 = vector.broadcast %3 : vector<1x128xf32> to vector<16x128xf32>
    %5 = arith.addf %2, %4 : vector<16x128xf32>
    %6 = arith.mulf %5, %5 : vector<16x128xf32>
    %7 = arith.mulf %5, %6 : vector<16x128xf32>
    %cst_5 = arith.constant 4.471500e-02 : f32
    %8 = vector.broadcast %cst_5 : f32 to vector<16x128xf32>
    %9 = arith.mulf %8, %7 : vector<16x128xf32>
    %10 = arith.addf %5, %9 : vector<16x128xf32>
    %cst_6 = arith.constant 0.797884583 : f32
    %11 = vector.broadcast %cst_6 : f32 to vector<16x128xf32>
    %12 = arith.mulf %11, %10 : vector<16x128xf32>
    %13 = math.tanh %12 : vector<16x128xf32>
    %cst_7 = arith.constant 1.000000e+00 : f32
    %14 = vector.broadcast %cst_7 : f32 to vector<16x128xf32>
    %15 = arith.addf %14, %13 : vector<16x128xf32>
    %cst_8 = arith.constant 5.000000e-01 : f32
    %16 = vector.broadcast %cst_8 : f32 to vector<16x128xf32>
    %17 = arith.mulf %16, %15 : vector<16x128xf32>
    %18 = arith.mulf %5, %17 : vector<16x128xf32>
    %cst_9 = arith.constant dense<0.000000e+00> : vector<16xf32>
    %19 = vector.multi_reduction <add>, %18, %cst_9 [1] : vector<16x128xf32> to vector<16xf32>
    %20 = vector.shape_cast %19 : vector<16xf32> to vector<16x1xf32>
    %cst_10 = arith.constant 7.812500e-03 : f32
    %21 = vector.broadcast %cst_10 : f32 to vector<16x1xf32>
    %22 = arith.mulf %20, %21 : vector<16x1xf32>
    %23 = vector.broadcast %22 : vector<16x1xf32> to vector<16x128xf32>
    %24 = arith.subf %18, %23 : vector<16x128xf32>
    %25 = arith.mulf %24, %24 : vector<16x128xf32>
    %cst_11 = arith.constant dense<0.000000e+00> : vector<16xf32>
    %26 = vector.multi_reduction <add>, %25, %cst_11 [1] : vector<16x128xf32> to vector<16xf32>
    %27 = vector.shape_cast %26 : vector<16xf32> to vector<16x1xf32>
    %cst_12 = arith.constant 7.812500e-03 : f32
    %28 = vector.broadcast %cst_12 : f32 to vector<16x1xf32>
    %29 = arith.mulf %27, %28 : vector<16x1xf32>
    %cst_13 = arith.constant 9.99999996E-13 : f32
    %30 = vector.broadcast %cst_13 : f32 to vector<16x1xf32>
    %31 = arith.addf %29, %30 : vector<16x1xf32>
    %32 = math.rsqrt %31 : vector<16x1xf32>
    %33 = vector.broadcast %32 : vector<16x1xf32> to vector<16x128xf32>
    %34 = arith.mulf %24, %33 : vector<16x128xf32>
    %c0_14 = arith.constant 0 : index
    %c0_15 = arith.constant 0 : index
    %35 = vector.load %arg4[%c0_14, %c0_15] : memref<1x128xf32, #tpu.memory_space<vmem>>, vector<1x128xf32>
    %36 = vector.broadcast %35 : vector<1x128xf32> to vector<16x128xf32>
    %37 = arith.mulf %34, %36 : vector<16x128xf32>
    %c0_16 = arith.constant 0 : index
    %c0_17 = arith.constant 0 : index
    %38 = vector.load %arg5[%c0_16, %c0_17] : memref<1x128xf32, #tpu.memory_space<vmem>>, vector<1x128xf32>
    %39 = vector.broadcast %38 : vector<1x128xf32> to vector<16x128xf32>
    %40 = arith.addf %37, %39 : vector<16x128xf32>
    %41 = arith.truncf %40 : vector<16x128xf32> to vector<16x128xbf16>
    %c0_18 = arith.constant 0 : index
    %c0_19 = arith.constant 0 : index
    %42 = vector.load %arg6[%c0_18, %c0_19] : memref<16x128xbf16, #tpu.memory_space<vmem>>, vector<16x128xbf16>
    tpu.vector_store %arg6[%c0_18, %c0_19], %41 {strides = array<i32>} : memref<16x128xbf16, #tpu.memory_space<vmem>>, vector<16x128xbf16>,
    return
  }
  func.func @transform_0(%arg0: i32) -> (i32, i32) {
    %c0_i32 = arith.constant 0 : i32
    %c0_i32_0 = arith.constant 0 : i32
    return %arg0, %c0_i32 : i32, i32
  }
  func.func @transform_1(%arg0: i32) -> (i32, i32) {
    %c0_i32 = arith.constant 0 : i32
    %c0_i32_0 = arith.constant 0 : i32
    %c0_i32_1 = arith.constant 0 : i32
    return %c0_i32, %c0_i32_0 : i32, i32
  }
  func.func @transform_2(%arg0: i32) -> (i32, i32) {
    %c0_i32 = arith.constant 0 : i32
    %c0_i32_0 = arith.constant 0 : i32
    %c0_i32_1 = arith.constant 0 : i32
    return %c0_i32, %c0_i32_0 : i32, i32
  }
  func.func @transform_3(%arg0: i32) -> (i32, i32) {
    %c0_i32 = arith.constant 0 : i32
    %c0_i32_0 = arith.constant 0 : i32
    %c0_i32_1 = arith.constant 0 : i32
    return %c0_i32, %c0_i32_0 : i32, i32
  }
  func.func @transform_4(%arg0: i32) -> (i32, i32) {
    %c0_i32 = arith.constant 0 : i32
    %c0_i32_0 = arith.constant 0 : i32
    %c0_i32_1 = arith.constant 0 : i32
    return %c0_i32, %c0_i32_0 : i32, i32
  }
  func.func @transform_5(%arg0: i32) -> (i32, i32) {
    %c0_i32 = arith.constant 0 : i32
    %c0_i32_0 = arith.constant 0 : i32
    return %arg0, %c0_i32 : i32, i32
  }
}

module attributes {stable_mosaic.version = 11 : i64} {
  func.func @_head_transform_kernel(%arg0: i32, %arg1: memref<16x128xbf16, #tpu.memory_space<vmem>>, %arg2: memref<128x128xbf16, #tpu.memory_space<vmem>>, %arg3: memref<1x128xf32, #tpu.memory_space<vmem>>, %arg4: memref<1x128xf32, #tpu.memory_space<vmem>>, %arg5: memref<1x128xf32, #tpu.memory_space<vmem>>, %arg6: memref<16x128xbf16, #tpu.memory_space<vmem>>) attributes {dimension_semantics = [#tpu.dimension_semantics<parallel>], iteration_bounds = array<i64: 1>, scalar_prefetch = 0 : i64, scratch_operands = 0 : i64, tpu.core_type = #tpu.core_type<tc>, window_params = [{transform_indices = @transform_0, window_bounds = array<i64: 16, 128>}, {pipeline_mode = #tpu.pipeline_mode<synchronous>, transform_indices = @transform_1, window_bounds = array<i64: 128, 128>}, {pipeline_mode = #tpu.pipeline_mode<synchronous>, transform_indices = @transform_2, window_bounds = array<i64: 1, 128>}, {pipeline_mode = #tpu.pipeline_mode<synchronous>, transform_indices = @transform_3, window_bounds = array<i64: 1, 128>}, {pipeline_mode = #tpu.pipeline_mode<synchronous>, transform_indices = @transform_4, window_bounds = array<i64: 1, 128>}, {transform_indices = @transform_5, window_bounds = array<i64: 16, 128>}]} {
    %c0 = arith.constant 0 : index
    %c0_0 = arith.constant 0 : index
    %0 = vector.load %arg1[%c0, %c0_0] : memref<16x128xbf16, #tpu.memory_space<vmem>>, vector<16x128xbf16>
    %c0_1 = arith.constant 0 : index
    %c0_2 = arith.constant 0 : index
    %1 = vector.load %arg2[%c0_1, %c0_2] : memref<128x128xbf16, #tpu.memory_space<vmem>>, vector<128x128xbf16>
    %cst = arith.constant dense<0.000000e+00> : vector<16x128xf32>
    %2 = tpu.matmul %0, %1, %cst {dimension_numbers = #tpu.dot_dimension_numbers<[1], [0], [0], [1], [0, 0, 1, 1], [], []>} : vector<16x128xbf16>, vector<128x128xbf16>, vector<16x128xf32> -> vector<16x128xf32>
    %c0_3 = arith.constant 0 : index
    %c0_4 = arith.constant 0 : index
    %3 = vector.load %arg3[%c0_3, %c0_4] : memref<1x128xf32, #tpu.memory_space<vmem>>, vector<1x128xf32>
    %4 = vector.broadcast %3 : vector<1x128xf32> to vector<16x128xf32>
    %5 = arith.addf %2, %4 : vector<16x128xf32>
    %6 = arith.mulf %5, %5 : vector<16x128xf32>
    %7 = arith.mulf %5, %6 : vector<16x128xf32>
    %cst_5 = arith.constant 4.471500e-02 : f32
    %8 = vector.broadcast %cst_5 : f32 to vector<16x128xf32>
    %9 = arith.mulf %8, %7 : vector<16x128xf32>
    %10 = arith.addf %5, %9 : vector<16x128xf32>
    %cst_6 = arith.constant 0.797884583 : f32
    %11 = vector.broadcast %cst_6 : f32 to vector<16x128xf32>
    %12 = arith.mulf %11, %10 : vector<16x128xf32>
    %13 = math.tanh %12 : vector<16x128xf32>
    %cst_7 = arith.constant 1.000000e+00 : f32
    %14 = vector.broadcast %cst_7 : f32 to vector<16x128xf32>
    %15 = arith.addf %14, %13 : vector<16x128xf32>
    %cst_8 = arith.constant 5.000000e-01 : f32
    %16 = vector.broadcast %cst_8 : f32 to vector<16x128xf32>
    %17 = arith.mulf %16, %15 : vector<16x128xf32>
    %18 = arith.mulf %5, %17 : vector<16x128xf32>
    %cst_9 = arith.constant dense<0.000000e+00> : vector<16xf32>
    %19 = vector.multi_reduction <add>, %18, %cst_9 [1] : vector<16x128xf32> to vector<16xf32>
    %20 = vector.shape_cast %19 : vector<16xf32> to vector<16x1xf32>
    %cst_10 = arith.constant 7.812500e-03 : f32
    %21 = vector.broadcast %cst_10 : f32 to vector<16x1xf32>
    %22 = arith.mulf %20, %21 : vector<16x1xf32>
    %23 = vector.broadcast %22 : vector<16x1xf32> to vector<16x128xf32>
    %24 = arith.subf %18, %23 : vector<16x128xf32>
    %25 = arith.mulf %24, %24 : vector<16x128xf32>
    %cst_11 = arith.constant dense<0.000000e+00> : vector<16xf32>
    %26 = vector.multi_reduction <add>, %25, %cst_11 [1] : vector<16x128xf32> to vector<16xf32>
    %27 = vector.shape_cast %26 : vector<16xf32> to vector<16x1xf32>
    %cst_12 = arith.constant 7.812500e-03 : f32
    %28 = vector.broadcast %cst_12 : f32 to vector<16x1xf32>
    %29 = arith.mulf %27, %28 : vector<16x1xf32>
    %cst_13 = arith.constant 9.99999996E-13 : f32
    %30 = vector.broadcast %cst_13 : f32 to vector<16x1xf32>
    %31 = arith.addf %29, %30 : vector<16x1xf32>
    %32 = math.rsqrt %31 : vector<16x1xf32>
    %33 = vector.broadcast %32 : vector<16x1xf32> to vector<16x128xf32>
    %34 = arith.mulf %24, %33 : vector<16x128xf32>
    %c0_14 = arith.constant 0 : index
    %c0_15 = arith.constant 0 : index
    %35 = vector.load %arg4[%c0_14, %c0_15] : memref<1x128xf32, #tpu.memory_space<vmem>>, vector<1x128xf32>
    %36 = vector.broadcast %35 : vector<1x128xf32> to vector<16x128xf32>
    %37 = arith.mulf %34, %36 : vector<16x128xf32>
    %c0_16 = arith.constant 0 : index
    %c0_17 = arith.constant 0 : index
    %38 = vector.load %arg5[%c0_16, %c0_17] : memref<1x128xf32, #tpu.memory_space<vmem>>, vector<1x128xf32>
    %39 = vector.broadcast %38 : vector<1x128xf32> to vector<16x128xf32>
    %40 = arith.addf %37, %39 : vector<16x128xf32>
    %41 = arith.truncf %40 : vector<16x128xf32> to vector<16x128xbf16>
    %c0_18 = arith.constant 0 : index
    %c0_19 = arith.constant 0 : index
    %42 = vector.load %arg6[%c0_18, %c0_19] : memref<16x128xbf16, #tpu.memory_space<vmem>>, vector<16x128xbf16>
    tpu.vector_store %arg6[%c0_18, %c0_19], %41 {strides = array<i32>} : memref<16x128xbf16, #tpu.memory_space<vmem>>, vector<16x128xbf16>,
    return
  }
  func.func @transform_0(%arg0: i32) -> (i32, i32) {
    %c0_i32 = arith.constant 0 : i32
    %c0_i32_0 = arith.constant 0 : i32
    return %arg0, %c0_i32 : i32, i32
  }
  func.func @transform_1(%arg0: i32) -> (i32, i32) {
    %c0_i32 = arith.constant 0 : i32
    %c0_i32_0 = arith.constant 0 : i32
    %c0_i32_1 = arith.constant 0 : i32
    return %c0_i32, %c0_i32_0 : i32, i32
  }
  func.func @transform_2(%arg0: i32) -> (i32, i32) {
    %c0_i32 = arith.constant 0 : i32
    %c0_i32_0 = arith.constant 0 : i32
    %c0_i32_1 = arith.constant 0 : i32
    return %c0_i32, %c0_i32_0 : i32, i32
  }
  func.func @transform_3(%arg0: i32) -> (i32, i32) {
    %c0_i32 = arith.constant 0 : i32
    %c0_i32_0 = arith.constant 0 : i32
    %c0_i32_1 = arith.constant 0 : i32
    return %c0_i32, %c0_i32_0 : i32, i32
  }
  func.func @transform_4(%arg0: i32) -> (i32, i32) {
    %c0_i32 = arith.constant 0 : i32
    %c0_i32_0 = arith.constant 0 : i32
    %c0_i32_1 = arith.constant 0 : i32
    return %c0_i32, %c0_i32_0 : i32, i32
  }
  func.func @transform_5(%arg0: i32) -> (i32, i32) {
    %c0_i32 = arith.constant 0 : i32
    %c0_i32_0 = arith.constant 0 : i32
    return %arg0, %c0_i32 : i32, i32
  }
}

</mosaic_0001>

<bundles_post_ra>
// kernel: tpu_custom_call.1
= control target key start
LH: loop header
LB: loop body
LE: loop exit
PB: predicated region body
PF: predicated region fallthrough
CT: control target
= control target key end

     0   :  { %10 = vsyncpa [#allocation3], 0  ;;  %s493_s0 = inlined_call_operand.hbm [shape: bf16[16,128], index: 0, kind: input, shape index: {}]   ;;  %s494_s1 = inlined_call_operand.hbm [shape: bf16[128,128], index: 1, kind: input, shape index: {}]   ;;  %s495_s2 = inlined_call_operand.vmem [shape: f32[1,128], index: 2, kind: input, shape index: {}]   ;;  %s496_s3 = inlined_call_operand.vmem [shape: f32[1,128], index: 3, kind: input, shape index: {}]   ;;  %s497_s4 = inlined_call_operand.vmem [shape: f32[1,128], index: 4, kind: input, shape index: {}]   ;;  %s498_s5 = inlined_call_operand.hbm [shape: bf16[16,128], index: 5, kind: output, shape index: {}]  }
   0x1   :  { %11 = vsyncpa [#allocation6], 0 }
   0x2   :  { %12 = vsyncpa [#allocation4], 0  ;;  %s402_s18 = smov [#allocation2]   ;;  %s330_s22 = scalar_lea.hbm %s493_s0, 128 }
   0x3   :  { %s18_s19 = sshll.u32 %s402_s18, 4  ;;  %p331_p0 = scmp.ne.s32.totalorder %s493_s0, %s330_s22  ;;  %s19_s19 = int_to_ptr.vmem [resolvable:$true] %s18_s19 }
   0x4   :  { %p334_p1 = scmp.lt.u32.totalorder %s330_s22, %s493_s0 }
   0x6   :  { %p336_p2 = pnand %p334_p1, %p331_p0 }
   0x8   :  { %339 = shalt.err (!%p336_p2)
}
   0x9   :  { %s340_s27 = scalar_lea.vmem %s19_s19, 128  ;;  %p345_p4 = scmp.lt.s32.totalorder %s19_s19, %s19_s19 }
   0xa   :  { %p341_p3 = scmp.ne.s32.totalorder %s19_s19, %s340_s27  ;;  %p346_p5 = scmp.lt.s32.totalorder %s340_s27, %s340_s27 }
   0xc   :  { %p347_p6 = por %p346_p5, %p345_p4 }
   0xe   :  { %p348_p7 = pnand %p347_p6, %p341_p3 }
  0x10   :  { %351 = shalt.err (!%p348_p7)
}
  0x11   :  { %s403_s28 = smov 64   ;;  %s404_s29 = smov 4  }
  0x12   :  { %24 = dma.hbm_to_vmem [thread:$0]  %s493_s0, 128, %s19_s19, [#allocation3], %s403_s28, %s403_s28, %s404_s29  }
  0x13   :  { %s405_s7 = smov [#allocation5]   ;;  %s352_s11 = scalar_lea.hbm %s494_s1, 1024 }
  0x14   :  { %s30_s8 = sshll.u32 %s405_s7, 4  ;;  %p353_p8 = scmp.ne.s32.totalorder %s494_s1, %s352_s11  ;;  %s31_s8 = int_to_ptr.vmem [resolvable:$true] %s30_s8 }
  0x15   :  { %p356_p9 = scmp.lt.u32.totalorder %s352_s11, %s494_s1 }
  0x17   :  { %p358_p10 = pnand %p356_p9, %p353_p8 }
  0x19   :  { %361 = shalt.err (!%p358_p10)
}
  0x1a   :  { %s362_s16 = scalar_lea.vmem %s31_s8, 1024  ;;  %p367_p12 = scmp.lt.s32.totalorder %s31_s8, %s31_s8 }
  0x1b   :  { %p363_p11 = scmp.ne.s32.totalorder %s31_s8, %s362_s16  ;;  %p368_p13 = scmp.lt.s32.totalorder %s362_s16, %s362_s16 }
  0x1d   :  { %p369_p0 = por %p368_p13, %p367_p12 }
  0x1f   :  { %p370_p1 = pnand %p369_p0, %p363_p11 }
  0x21   :  { %373 = shalt.err (!%p370_p1)
}
  0x22   :  { %36 = dma.hbm_to_vmem [thread:$0]  %s494_s1, 1024, %s31_s8, [#allocation6], %s403_s28, %s403_s28, %s404_s29  }
  0x23   :  { %396 = dma.done.wait [#allocation3], 128  }
  0x24   :  { %397 = vsyncadd [#allocation3], 4294967168 }
  0x25   :  { %398 = dma.done.wait [#allocation6], 1024  }
  0x26   :  { %399 = vsyncadd [#allocation6], 4294966272  ;;  %v406_v0 = vmov 0.0   ;;  %vm407_vm0 = vmmov 0   ;;  %v313_v1 = vld [vmem:[#allocation5] sm:$0xff]   ;;  %v314_v2 = vld [vmem:[#allocation5 + $0x8] sm:$0xff]  }
  0x27   :  { %286 = vmatprep.subr.bf16.mxu0 %v406_v0  ;;  %302 = vmatprep.mubr.msk.bf16.mxu0 %vm407_vm0, %v406_v0  ;;  %v315_v3 = vld [vmem:[#allocation5 + $0x10] sm:$0xff]   ;;  %v316_v4 = vld [vmem:[#allocation5 + $0x18] sm:$0xff]   ;;  %v317_v5 = vld [vmem:[#allocation5 + $0x20] sm:$0xff]   ;;  %s408_s22 = smov [#allocation7]  }
  0x28   :  { %287 = vmatpush3.bf16.msra.mxu0 %v313_v1  ;;  %v318_v6 = vld [vmem:[#allocation5 + $0x28] sm:$0xff]   ;;  %v319_v7 = vld [vmem:[#allocation5 + $0x30] sm:$0xff]   ;;  %v320_v8 = vld [vmem:[#allocation5 + $0x38] sm:$0xff]   ;;  %s243_s23 = sshll.u32 %s408_s22, 4  ;;  %s244_s23 = int_to_ptr.vmem [resolvable:$true] %s243_s23 }
  0x29   :  { %288 = vmatprep.subr.bf16.mxu0 %v406_v0  ;;  %v321_v9 = vld [vmem:[#allocation2] sm:$0xff]   ;;  %s374_s24 = scalar_lea.vmem %s244_s23, 128  ;;  %p379_p3 = scmp.lt.s32.totalorder %s244_s23, %s244_s23 }
  0x2a   :  { %v256_v10 = vld [vmem:[%s495_s2] ss:$0 sm:$0xff]  ;;  %p375_p2 = scmp.ne.s32.totalorder %s244_s23, %s374_s24  ;;  %p380_p4 = scmp.lt.s32.totalorder %s374_s24, %s374_s24 }
  0x2b   :  { %v266_v51 = vld [vmem:[%s496_s3] ss:$0 sm:$0xff] }
  0x2c   :  { %289 = vmatpush3.bf16.msra.mxu0 %v314_v2  ;;  %v267_v55 = vld [vmem:[%s497_s4] ss:$0 sm:$0xff]  ;;  %p381_p5 = por %p380_p4, %p379_p3 }
  0x2d   :  { %290 = vmatprep.subr.bf16.mxu0 %v406_v0 }
  0x2e   :  { %p382_p6 = pnand %p381_p5, %p375_p2 }
  0x30   :  { %291 = vmatpush3.bf16.msra.mxu0 %v315_v3 }
  0x31   :  { %292 = vmatprep.subr.bf16.mxu0 %v406_v0 }
  0x34   :  { %293 = vmatpush3.bf16.msra.mxu0 %v316_v4 }
  0x35   :  { %294 = vmatprep.subr.bf16.mxu0 %v406_v0 }
  0x38   :  { %295 = vmatpush3.bf16.msra.mxu0 %v317_v5 }
  0x39   :  { %296 = vmatprep.subr.bf16.mxu0 %v406_v0 }
  0x3c   :  { %297 = vmatpush3.bf16.msra.mxu0 %v318_v6 }
  0x3d   :  { %298 = vmatprep.subr.bf16.mxu0 %v406_v0 }
  0x40   :  { %299 = vmatpush3.bf16.msra.mxu0 %v319_v7 }
  0x41   :  { %300 = vmatprep.subr.bf16.mxu0 %v406_v0 }
  0x44   :  { %301 = vmatpush3.bf16.msra.mxu0 %v320_v8 }
  0x47   :  { %303 = vmatmul.mubr.bf16.vlgmr.msra.gmra.mrb[0].mxu0 %v321_v9 }
 0x11a   :  { %v163_v11 = vpop.f32.mrb[0].mxu0 }
 0x11b   :  { %v164_v12 = vadd.f32 %v256_v10, %v163_v11  ;;  %v304_v13 = vpop.f32.mrb[1].mxu0 }
 0x11c   :  { %v166_v14 = vpop.f32.mrb[2].mxu0 }
 0x11d   :  { %v170_v15 = vmul.f32 %v164_v12, %v164_v12  ;;  %v167_v16 = vadd.f32 %v256_v10, %v166_v14  ;;  %v305_v17 = vpop.f32.mrb[3].mxu0 }
 0x11f   :  { %v172_v18 = vmul.f32 %v170_v15, %v164_v12  ;;  %v171_v19 = vmul.f32 %v167_v16, %v167_v16 }
 0x121   :  { %v174_v20 = vmul.f32 0.044715, %v172_v18  ;;  %v173_v21 = vmul.f32 %v171_v19, %v167_v16 }
 0x123   :  { %v175_v22 = vmul.f32 0.044715, %v173_v21  ;;  %v176_v23 = vadd.f32 %v174_v20, %v164_v12 }
 0x125   :  { %v178_v24 = vmul.f32 0.7978846, %v176_v23  ;;  %v177_v25 = vadd.f32 %v175_v22, %v167_v16 }
 0x127   :  { %322 = vtanh.f32 %v178_v24  ;;  %v179_v26 = vmul.f32 0.7978846, %v177_v25 }
 0x129   :  { %324 = vtanh.f32 %v179_v26 }
 0x131   :  { %v323_v27 = vpop.eup %322 }
 0x132   :  { %v182_v28 = vadd.f32 1.0, %v323_v27 }
 0x133   :  { %v325_v29 = vpop.eup %324 }
 0x134   :  { %v184_v30 = vmul.f32 0.5, %v182_v28  ;;  %v183_v31 = vadd.f32 1.0, %v325_v29 }
 0x136   :  { %v186_v32 = vmul.f32 %v184_v30, %v164_v12  ;;  %v185_v33 = vmul.f32 0.5, %v183_v31 }
 0x138   :  { %188 = vadd.xlane.f32.xlu0 %v186_v32  ;;  %v187_v34 = vmul.f32 %v185_v33, %v167_v16 }
 0x13c   :  { %190 = vadd.xlane.f32.xlu0 %v187_v34 }
 0x1c5   :  { %v189_v35 = vpop.xlane.xlu0 %188 }
 0x1c6   :  { %v192_v36 = vmul.f32 0.0078125, %v189_v35 }
 0x1c8   :  { %v194_v37 = vsub.f32 %v186_v32, %v192_v36 }
 0x1c9   :  { %v191_v38 = vpop.xlane.xlu0 %190 }
 0x1ca   :  { %v193_v39 = vmul.f32 0.0078125, %v191_v38  ;;  %v196_v40 = vmul.f32 %v194_v37, %v194_v37 }
 0x1cc   :  { %v195_v41 = vsub.f32 %v187_v34, %v193_v39  ;;  %198 = vadd.xlane.f32.xlu1 %v196_v40 }
 0x1ce   :  { %v197_v42 = vmul.f32 %v195_v41, %v195_v41 }
 0x1d0   :  { %200 = vadd.xlane.f32.xlu1 %v197_v42 }
 0x259   :  { %v199_v43 = vpop.xlane.xlu1 %198 }
 0x25a   :  { %v202_v44 = vmul.f32 0.0078125, %v199_v43 }
 0x25c   :  { %v204_v45 = vadd.f32 1e-12, %v202_v44 }
 0x25d   :  { %v201_v46 = vpop.xlane.xlu1 %200 }
 0x25e   :  { %326 = vrsqrt.f32 %v204_v45  ;;  %v203_v47 = vmul.f32 0.0078125, %v201_v46 }
 0x260   :  { %v205_v48 = vadd.f32 1e-12, %v203_v47 }
 0x262   :  { %328 = vrsqrt.f32 %v205_v48 }
 0x268   :  { %v327_v49 = vpop.eup %326 }
 0x269   :  { %v208_v50 = vmul.f32 %v327_v49, %v194_v37 }
 0x26b   :  { %v217_v54 = vmul.f32 %v266_v51, %v208_v50 }
 0x26c   :  { %v329_v52 = vpop.eup %328 }
 0x26d   :  { %v209_v53 = vmul.f32 %v329_v52, %v195_v41  ;;  %v226_v57 = vadd.f32 %v267_v55, %v217_v54 }
 0x26f   :  { %v218_v56 = vmul.f32 %v266_v51, %v209_v53 }
 0x271   :  { %v227_v58 = vadd.f32 %v267_v55, %v218_v56 }
 0x273   :  { %v275_v59 = vpack.c.bf16 %v227_v58, %v226_v57 }
 0x275   :  { %276 = vst [vmem:[#allocation7] sm:$0xff] %v275_v59  }
 0x276   :  { %385 = shalt.err (!%p382_p6)
}
 0x277   :  { %s386_s26 = scalar_lea.hbm %s498_s5, 128 }
 0x278   :  { %p387_p7 = scmp.ne.s32.totalorder %s498_s5, %s386_s26  ;;  %p390_p8 = scmp.lt.u32.totalorder %s386_s26, %s498_s5 }
 0x27a   :  { %p392_p9 = pnand %p390_p8, %p387_p7 }
 0x27c   :  { %395 = shalt.err (!%p392_p9)
}
 0x27d   :  { %249 = dma.vmem_to_hbm [thread:$0]  %s244_s23, 128, %s498_s5, [#allocation4], %s403_s28, %s403_s28, %s404_s29  }
 0x27e   :  { %400 = dma.done.wait [#allocation4], 128  }
 0x27f   :  { %401 = vsyncadd [#allocation4], 4294967168 }
 0x280   :  { %253 = vsyncpa [#allocation3], 1 }
 0x281   :  { %254 = vsyncpa [#allocation6], 1 }
 0x282   :  { %255 = vsyncpa [#allocation4], 1 }

// kernel: tpu_custom_call.1
= control target key start
LH: loop header
LB: loop body
LE: loop exit
PB: predicated region body
PF: predicated region fallthrough
CT: control target
= control target key end

     0   :  { %10 = vsyncpa [#allocation3], 0  ;;  %s493_s0 = inlined_call_operand.hbm [shape: bf16[16,128], index: 0, kind: input, shape index: {}]   ;;  %s494_s1 = inlined_call_operand.hbm [shape: bf16[128,128], index: 1, kind: input, shape index: {}]   ;;  %s495_s2 = inlined_call_operand.vmem [shape: f32[1,128], index: 2, kind: input, shape index: {}]   ;;  %s496_s3 = inlined_call_operand.vmem [shape: f32[1,128], index: 3, kind: input, shape index: {}]   ;;  %s497_s4 = inlined_call_operand.vmem [shape: f32[1,128], index: 4, kind: input, shape index: {}]   ;;  %s498_s5 = inlined_call_operand.hbm [shape: bf16[16,128], index: 5, kind: output, shape index: {}]  }
   0x1   :  { %11 = vsyncpa [#allocation6], 0 }
   0x2   :  { %12 = vsyncpa [#allocation4], 0  ;;  %s402_s18 = smov [#allocation2]   ;;  %s330_s22 = scalar_lea.hbm %s493_s0, 128 }
   0x3   :  { %s18_s19 = sshll.u32 %s402_s18, 4  ;;  %p331_p0 = scmp.ne.s32.totalorder %s493_s0, %s330_s22  ;;  %s19_s19 = int_to_ptr.vmem [resolvable:$true] %s18_s19 }
   0x4   :  { %p334_p1 = scmp.lt.u32.totalorder %s330_s22, %s493_s0 }
   0x6   :  { %p336_p2 = pnand %p334_p1, %p331_p0 }
   0x8   :  { %339 = shalt.err (!%p336_p2)
}
   0x9   :  { %s340_s27 = scalar_lea.vmem %s19_s19, 128  ;;  %p345_p4 = scmp.lt.s32.totalorder %s19_s19, %s19_s19 }
   0xa   :  { %p341_p3 = scmp.ne.s32.totalorder %s19_s19, %s340_s27  ;;  %p346_p5 = scmp.lt.s32.totalorder %s340_s27, %s340_s27 }
   0xc   :  { %p347_p6 = por %p346_p5, %p345_p4 }
   0xe   :  { %p348_p7 = pnand %p347_p6, %p341_p3 }
  0x10   :  { %351 = shalt.err (!%p348_p7)
}
  0x11   :  { %s403_s28 = smov 64   ;;  %s404_s29 = smov 4  }
  0x12   :  { %24 = dma.hbm_to_vmem [thread:$0]  %s493_s0, 128, %s19_s19, [#allocation3], %s403_s28, %s403_s28, %s404_s29  }
  0x13   :  { %s405_s7 = smov [#allocation5]   ;;  %s352_s11 = scalar_lea.hbm %s494_s1, 1024 }
  0x14   :  { %s30_s8 = sshll.u32 %s405_s7, 4  ;;  %p353_p8 = scmp.ne.s32.totalorder %s494_s1, %s352_s11  ;;  %s31_s8 = int_to_ptr.vmem [resolvable:$true] %s30_s8 }
  0x15   :  { %p356_p9 = scmp.lt.u32.totalorder %s352_s11, %s494_s1 }
  0x17   :  { %p358_p10 = pnand %p356_p9, %p353_p8 }
  0x19   :  { %361 = shalt.err (!%p358_p10)
}
  0x1a   :  { %s362_s16 = scalar_lea.vmem %s31_s8, 1024  ;;  %p367_p12 = scmp.lt.s32.totalorder %s31_s8, %s31_s8 }
  0x1b   :  { %p363_p11 = scmp.ne.s32.totalorder %s31_s8, %s362_s16  ;;  %p368_p13 = scmp.lt.s32.totalorder %s362_s16, %s362_s16 }
  0x1d   :  { %p369_p0 = por %p368_p13, %p367_p12 }
  0x1f   :  { %p370_p1 = pnand %p369_p0, %p363_p11 }
  0x21   :  { %373 = shalt.err (!%p370_p1)
}
  0x22   :  { %36 = dma.hbm_to_vmem [thread:$0]  %s494_s1, 1024, %s31_s8, [#allocation6], %s403_s28, %s403_s28, %s404_s29  }
  0x23   :  { %396 = dma.done.wait [#allocation3], 128  }
  0x24   :  { %397 = vsyncadd [#allocation3], 4294967168 }
  0x25   :  { %398 = dma.done.wait [#allocation6], 1024  }
  0x26   :  { %399 = vsyncadd [#allocation6], 4294966272  ;;  %v406_v0 = vmov 0.0   ;;  %vm407_vm0 = vmmov 0   ;;  %v313_v1 = vld [vmem:[#allocation5] sm:$0xff]   ;;  %v314_v2 = vld [vmem:[#allocation5 + $0x8] sm:$0xff]  }
  0x27   :  { %286 = vmatprep.subr.bf16.mxu0 %v406_v0  ;;  %302 = vmatprep.mubr.msk.bf16.mxu0 %vm407_vm0, %v406_v0  ;;  %v315_v3 = vld [vmem:[#allocation5 + $0x10] sm:$0xff]   ;;  %v316_v4 = vld [vmem:[#allocation5 + $0x18] sm:$0xff]   ;;  %v317_v5 = vld [vmem:[#allocation5 + $0x20] sm:$0xff]   ;;  %s408_s22 = smov [#allocation7]  }
  0x28   :  { %287 = vmatpush3.bf16.msra.mxu0 %v313_v1  ;;  %v318_v6 = vld [vmem:[#allocation5 + $0x28] sm:$0xff]   ;;  %v319_v7 = vld [vmem:[#allocation5 + $0x30] sm:$0xff]   ;;  %v320_v8 = vld [vmem:[#allocation5 + $0x38] sm:$0xff]   ;;  %s243_s23 = sshll.u32 %s408_s22, 4  ;;  %s244_s23 = int_to_ptr.vmem [resolvable:$true] %s243_s23 }
  0x29   :  { %288 = vmatprep.subr.bf16.mxu0 %v406_v0  ;;  %v321_v9 = vld [vmem:[#allocation2] sm:$0xff]   ;;  %s374_s24 = scalar_lea.vmem %s244_s23, 128  ;;  %p379_p3 = scmp.lt.s32.totalorder %s244_s23, %s244_s23 }
  0x2a   :  { %v256_v10 = vld [vmem:[%s495_s2] ss:$0 sm:$0xff]  ;;  %p375_p2 = scmp.ne.s32.totalorder %s244_s23, %s374_s24  ;;  %p380_p4 = scmp.lt.s32.totalorder %s374_s24, %s374_s24 }
  0x2b   :  { %v266_v51 = vld [vmem:[%s496_s3] ss:$0 sm:$0xff] }
  0x2c   :  { %289 = vmatpush3.bf16.msra.mxu0 %v314_v2  ;;  %v267_v55 = vld [vmem:[%s497_s4] ss:$0 sm:$0xff]  ;;  %p381_p5 = por %p380_p4, %p379_p3 }
  0x2d   :  { %290 = vmatprep.subr.bf16.mxu0 %v406_v0 }
  0x2e   :  { %p382_p6 = pnand %p381_p5, %p375_p2 }
  0x30   :  { %291 = vmatpush3.bf16.msra.mxu0 %v315_v3 }
  0x31   :  { %292 = vmatprep.subr.bf16.mxu0 %v406_v0 }
  0x34   :  { %293 = vmatpush3.bf16.msra.mxu0 %v316_v4 }
  0x35   :  { %294 = vmatprep.subr.bf16.mxu0 %v406_v0 }
  0x38   :  { %295 = vmatpush3.bf16.msra.mxu0 %v317_v5 }
  0x39   :  { %296 = vmatprep.subr.bf16.mxu0 %v406_v0 }
  0x3c   :  { %297 = vmatpush3.bf16.msra.mxu0 %v318_v6 }
  0x3d   :  { %298 = vmatprep.subr.bf16.mxu0 %v406_v0 }
  0x40   :  { %299 = vmatpush3.bf16.msra.mxu0 %v319_v7 }
  0x41   :  { %300 = vmatprep.subr.bf16.mxu0 %v406_v0 }
  0x44   :  { %301 = vmatpush3.bf16.msra.mxu0 %v320_v8 }
  0x47   :  { %303 = vmatmul.mubr.bf16.vlgmr.msra.gmra.mrb[0].mxu0 %v321_v9 }
 0x11a   :  { %v163_v11 = vpop.f32.mrb[0].mxu0 }
 0x11b   :  { %v164_v12 = vadd.f32 %v256_v10, %v163_v11  ;;  %v304_v13 = vpop.f32.mrb[1].mxu0 }
 0x11c   :  { %v166_v14 = vpop.f32.mrb[2].mxu0 }
 0x11d   :  { %v170_v15 = vmul.f32 %v164_v12, %v164_v12  ;;  %v167_v16 = vadd.f32 %v256_v10, %v166_v14  ;;  %v305_v17 = vpop.f32.mrb[3].mxu0 }
 0x11f   :  { %v172_v18 = vmul.f32 %v170_v15, %v164_v12  ;;  %v171_v19 = vmul.f32 %v167_v16, %v167_v16 }
 0x121   :  { %v174_v20 = vmul.f32 0.044715, %v172_v18  ;;  %v173_v21 = vmul.f32 %v171_v19, %v167_v16 }
 0x123   :  { %v175_v22 = vmul.f32 0.044715, %v173_v21  ;;  %v176_v23 = vadd.f32 %v174_v20, %v164_v12 }
 0x125   :  { %v178_v24 = vmul.f32 0.7978846, %v176_v23  ;;  %v177_v25 = vadd.f32 %v175_v22, %v167_v16 }
 0x127   :  { %322 = vtanh.f32 %v178_v24  ;;  %v179_v26 = vmul.f32 0.7978846, %v177_v25 }
 0x129   :  { %324 = vtanh.f32 %v179_v26 }
 0x131   :  { %v323_v27 = vpop.eup %322 }
 0x132   :  { %v182_v28 = vadd.f32 1.0, %v323_v27 }
 0x133   :  { %v325_v29 = vpop.eup %324 }
 0x134   :  { %v184_v30 = vmul.f32 0.5, %v182_v28  ;;  %v183_v31 = vadd.f32 1.0, %v325_v29 }
 0x136   :  { %v186_v32 = vmul.f32 %v184_v30, %v164_v12  ;;  %v185_v33 = vmul.f32 0.5, %v183_v31 }
 0x138   :  { %188 = vadd.xlane.f32.xlu0 %v186_v32  ;;  %v187_v34 = vmul.f32 %v185_v33, %v167_v16 }
 0x13c   :  { %190 = vadd.xlane.f32.xlu0 %v187_v34 }
 0x1c5   :  { %v189_v35 = vpop.xlane.xlu0 %188 }
 0x1c6   :  { %v192_v36 = vmul.f32 0.0078125, %v189_v35 }
 0x1c8   :  { %v194_v37 = vsub.f32 %v186_v32, %v192_v36 }
 0x1c9   :  { %v191_v38 = vpop.xlane.xlu0 %190 }
 0x1ca   :  { %v193_v39 = vmul.f32 0.0078125, %v191_v38  ;;  %v196_v40 = vmul.f32 %v194_v37, %v194_v37 }
 0x1cc   :  { %v195_v41 = vsub.f32 %v187_v34, %v193_v39  ;;  %198 = vadd.xlane.f32.xlu1 %v196_v40 }
 0x1ce   :  { %v197_v42 = vmul.f32 %v195_v41, %v195_v41 }
 0x1d0   :  { %200 = vadd.xlane.f32.xlu1 %v197_v42 }
 0x259   :  { %v199_v43 = vpop.xlane.xlu1 %198 }
 0x25a   :  { %v202_v44 = vmul.f32 0.0078125, %v199_v43 }
 0x25c   :  { %v204_v45 = vadd.f32 1e-12, %v202_v44 }
 0x25d   :  { %v201_v46 = vpop.xlane.xlu1 %200 }
 0x25e   :  { %326 = vrsqrt.f32 %v204_v45  ;;  %v203_v47 = vmul.f32 0.0078125, %v201_v46 }
 0x260   :  { %v205_v48 = vadd.f32 1e-12, %v203_v47 }
 0x262   :  { %328 = vrsqrt.f32 %v205_v48 }
 0x268   :  { %v327_v49 = vpop.eup %326 }
 0x269   :  { %v208_v50 = vmul.f32 %v327_v49, %v194_v37 }
 0x26b   :  { %v217_v54 = vmul.f32 %v266_v51, %v208_v50 }
 0x26c   :  { %v329_v52 = vpop.eup %328 }
 0x26d   :  { %v209_v53 = vmul.f32 %v329_v52, %v195_v41  ;;  %v226_v57 = vadd.f32 %v267_v55, %v217_v54 }
 0x26f   :  { %v218_v56 = vmul.f32 %v266_v51, %v209_v53 }
 0x271   :  { %v227_v58 = vadd.f32 %v267_v55, %v218_v56 }
 0x273   :  { %v275_v59 = vpack.c.bf16 %v227_v58, %v226_v57 }
 0x275   :  { %276 = vst [vmem:[#allocation7] sm:$0xff] %v275_v59  }
 0x276   :  { %385 = shalt.err (!%p382_p6)
}
 0x277   :  { %s386_s26 = scalar_lea.hbm %s498_s5, 128 }
 0x278   :  { %p387_p7 = scmp.ne.s32.totalorder %s498_s5, %s386_s26  ;;  %p390_p8 = scmp.lt.u32.totalorder %s386_s26, %s498_s5 }
 0x27a   :  { %p392_p9 = pnand %p390_p8, %p387_p7 }
 0x27c   :  { %395 = shalt.err (!%p392_p9)
}
 0x27d   :  { %249 = dma.vmem_to_hbm [thread:$0]  %s244_s23, 128, %s498_s5, [#allocation4], %s403_s28, %s403_s28, %s404_s29  }
 0x27e   :  { %400 = dma.done.wait [#allocation4], 128  }
 0x27f   :  { %401 = vsyncadd [#allocation4], 4294967168 }
 0x280   :  { %253 = vsyncpa [#allocation3], 1 }
 0x281   :  { %254 = vsyncpa [#allocation6], 1 }
 0x282   :  { %255 = vsyncpa [#allocation4], 1 }

</bundles_post_ra>
